<compile_context>
chip_gen: v5e
topology: v5e:2x2
jax: 0.10.0
libtpu: 0.0.40
codegen_flags: <defaults>
</compile_context>

<pallas_src>
import functools

import jax
import jax.numpy as jnp
from jax.experimental import pallas as pl
from jax.experimental.pallas import tpu as pltpu

LANE = 128


def _round_up(x, m):
    return ((x + m - 1) // m) * m


def _pad2d(x, rows, cols):
    return jnp.pad(x, ((0, rows - x.shape[0]), (0, cols - x.shape[1])))


def _pick_tile(n, candidates):
    for t in candidates:
        if t <= n and n % t == 0:
            return t
    return n  # n is always a multiple of 128 here, so 128 always matches


def _padded_num_nodes(n):
    """Pad the node dim so the larger tile candidates can actually divide it."""
    n = max(n, 8)
    if n >= 2048:
        return _round_up(n, 512)
    if n >= 512:
        return _round_up(n, 256)
    return _round_up(n, LANE)


# ---------------------------------------------------------------------------
# Kernel 1: per-row-tile feature transform  Y = X @ Wl,  root = X @ Wr + b
# ---------------------------------------------------------------------------
def _transform_kernel(x_ref, wl_ref, wr_ref, b_ref, y_ref, root_ref):
    x = x_ref[...]                                     # (TM, Fin_p) bf16
    y_ref[...] = jnp.dot(
        x, wl_ref[...], preferred_element_type=jnp.float32
    ).astype(y_ref.dtype)
    root = jnp.dot(x, wr_ref[...], preferred_element_type=jnp.float32) + b_ref[...]
    root_ref[...] = root.astype(root_ref.dtype)


def sage_transform(X, Wl, Wr, b):
    """X: [Np, Fin_p] bf16, Wl/Wr: [Fin_p, Fout_p] bf16, b: [1, Fout_p] f32.

    Returns Y = X @ Wl (bf16) and root = X @ Wr + b (f32).
    """
    Np, Fin_p = X.shape
    Fout_p = Wl.shape[1]

    TM = _pick_tile(Np, (512, 256, 128))
    grid = (Np // TM,)

    flops = 4 * Np * Fin_p * Fout_p
    bytes_accessed = (
        Np * Fin_p * 2            # X (bf16)
        + 2 * Fin_p * Fout_p * 2  # Wl, Wr (bf16, read once - constant block index)
        + Fout_p * 4              # bias
        + Np * Fout_p * 2         # Y (bf16)
        + Np * Fout_p * 4         # root (f32)
    )

    return pl.pallas_call(
        _transform_kernel,
        out_shape=(
            jax.ShapeDtypeStruct((Np, Fout_p), jnp.bfloat16),
            jax.ShapeDtypeStruct((Np, Fout_p), jnp.float32),
        ),
        grid_spec=pltpu.PrefetchScalarGridSpec(
            num_scalar_prefetch=0,
            grid=grid,
            in_specs=[
                pl.BlockSpec((TM, Fin_p), lambda i: (i, 0)),        # X row tile
                pl.BlockSpec((Fin_p, Fout_p), lambda i: (0, 0)),    # Wl
                pl.BlockSpec((Fin_p, Fout_p), lambda i: (0, 0)),    # Wr
                pl.BlockSpec((1, Fout_p), lambda i: (0, 0)),        # bias
            ],
            out_specs=[
                pl.BlockSpec((TM, Fout_p), lambda i: (i, 0)),       # Y
                pl.BlockSpec((TM, Fout_p), lambda i: (i, 0)),       # root
            ],
        ),
        compiler_params=pltpu.CompilerParams(
            dimension_semantics=("parallel",),
        ),
        cost_estimate=pl.CostEstimate(
            flops=flops, transcendentals=0, bytes_accessed=bytes_accessed
        ),
    )(X, Wl, Wr, b)


# ---------------------------------------------------------------------------
# Kernel 2: mean aggregation  out = (A_cnt @ Y) * inv_deg + root   [ReLU]
# ---------------------------------------------------------------------------
def _aggregate_kernel(a_ref, y_ref, invdeg_ref, root_ref, o_ref, acc_ref, *,
                      apply_relu):
    """Grid: (i, k) = (row tiles of A/out, reduction tiles over A's columns).

      a_ref     : [TM, TK]      int8   edge-count adjacency tile ({0,1,..}, exact)
      y_ref     : [TK, Fout_p]  bf16   K-tile of X @ Wl
      invdeg_ref: [TM, 1]       f32    1 / in_degree  (0 for isolated nodes)
      root_ref  : [TM, Fout_p]  f32    X @ Wr + b row tile
      o_ref     : [TM, Fout_p]  bf16/f32  (resident across k; written at last k)
      acc_ref   : [TM, Fout_p]  f32    VMEM scratch accumulator
    """
    k = pl.program_id(1)

    @pl.when(k == 0)
    def _init():
        acc_ref[...] = jnp.zeros_like(acc_ref)

    # MXU: bf16 x bf16 -> f32 accumulate.  int8 counts are exact in bf16.
    acc_ref[...] += jnp.dot(
        a_ref[...].astype(jnp.bfloat16),
        y_ref[...],
        preferred_element_type=jnp.float32,
    )

    @pl.when(k == pl.num_programs(1) - 1)
    def _finalize():
        out = acc_ref[...] * invdeg_ref[...] + root_ref[...]
        if apply_relu:
            out = jnp.maximum(out, 0.0)
        o_ref[...] = out.astype(o_ref.dtype)


def sage_aggregate(A, Y, inv_deg, root, *, apply_relu, out_dtype):
    """A: [Np, Np] int8, Y: [Np, Fout_p] bf16, inv_deg: [Np, 1] f32, root: [Np, Fout_p] f32."""
    Np = A.shape[0]
    Fout_p = Y.shape[1]

    # Row tile: keep >= 2 row tiles whenever possible so the "parallel" axis actually
    # shards across v7x's two TensorCores.
    tm_cands = (512, 256, 128)
    if Np >= 256:
        tm_cands = tuple(t for t in tm_cands if t <= Np // 2) or (128,)
    TM = _pick_tile(Np, tm_cands)
    TK = _pick_tile(Np, (2048, 1024, 512, 256, 128))
    grid = (Np // TM, Np // TK)

    out_bytes = jnp.dtype(out_dtype).itemsize
    flops = 2 * Np * Np * Fout_p
    bytes_accessed = (
        Np * Np * 1                          # A (int8)
        + (Np // TM) * Np * Fout_p * 2       # Y re-read once per row tile (bf16)
        + Np * 4                             # inv_deg
        + Np * Fout_p * 4                    # root
        + Np * Fout_p * out_bytes            # output
    )

    # VMEM budget (double-buffered inputs/outputs + f32 accumulator), with headroom;
    # capped well below v7x's 64 MiB physical VMEM.
    vmem_bytes = (
        2 * TM * TK * 1
        + 2 * TK * Fout_p * 2
        + 2 * TM * 4
        + 2 * TM * Fout_p * 4
        + 2 * TM * Fout_p * out_bytes
        + TM * Fout_p * 4
    )
    vmem_limit = int(min(max(2 * vmem_bytes, 32 * 1024 * 1024), 48 * 1024 * 1024))

    kernel = functools.partial(_aggregate_kernel, apply_relu=apply_relu)

    return pl.pallas_call(
        kernel,
        out_shape=jax.ShapeDtypeStruct((Np, Fout_p), out_dtype),
        grid_spec=pltpu.PrefetchScalarGridSpec(
            num_scalar_prefetch=0,
            grid=grid,
            in_specs=[
                pl.BlockSpec((TM, TK), lambda i, k: (i, k)),       # A tile (int8)
                pl.BlockSpec((TK, Fout_p), lambda i, k: (k, 0)),   # Y K-tile (bf16)
                pl.BlockSpec((TM, 1), lambda i, k: (i, 0)),        # 1/deg row scale
                pl.BlockSpec((TM, Fout_p), lambda i, k: (i, 0)),   # root term
            ],
            out_specs=pl.BlockSpec((TM, Fout_p), lambda i, k: (i, 0)),
            scratch_shapes=[pltpu.VMEM((TM, Fout_p), jnp.float32)],
        ),
        compiler_params=pltpu.CompilerParams(
            dimension_semantics=("parallel", "arbitrary"),
            vmem_limit_bytes=vmem_limit,
        ),
        cost_estimate=pl.CostEstimate(
            flops=flops, transcendentals=0, bytes_accessed=bytes_accessed
        ),
    )(A, Y, inv_deg, root)


# ---------------------------------------------------------------------------
# Graph preprocessing and forward pass
# ---------------------------------------------------------------------------
def build_adjacency(edge_index, padded_nodes):
    """A[dst, src] = #edges src->dst as int8 (exact), inv_deg[dst] = 1/in_degree as f32.

    Scatters edge counts directly at the padded size (no dense f32 counts matrix, no
    per-element divide); the kernels stream the 1-byte A every layer.  Padded rows /
    columns stay zero so padded nodes never contaminate real rows through aggregation.
    """
    src, dst = edge_index[0], edge_index[1]
    counts = jnp.zeros((padded_nodes, padded_nodes), jnp.int32).at[dst, src].add(1)
    A = counts.astype(jnp.int8)  # exact for < 128 parallel edges per (src, dst) pair
    deg = jnp.zeros((padded_nodes, 1), jnp.float32).at[dst, 0].add(1.0)
    inv_deg = jnp.where(deg > 0.0, 1.0 / jnp.where(deg > 0.0, deg, 1.0), 0.0)
    return A, inv_deg


def init_params(key, input_channels, hidden_channels, output_channels, num_layers=2):
    """Deterministic synthetic init (PyG SAGEConv layout, transposed to [in, out])."""
    dims = [(input_channels, hidden_channels)]
    for _ in range(num_layers - 1):
        dims.append((hidden_channels, hidden_channels))
    dims.append((hidden_channels, output_channels))

    params = []
    for (fin, fout) in dims:
        key, k1, k2, k3 = jax.random.split(key, 4)
        scale = 1.0 / jnp.sqrt(jnp.float32(fin))
        Wl = jax.random.uniform(k1, (fin, fout), jnp.float32, -scale, scale)
        Wr = jax.random.uniform(k2, (fin, fout), jnp.float32, -scale, scale)
        b = jax.random.uniform(k3, (1, fout), jnp.float32, -scale, scale)
        params.append((Wl, Wr, b))
    return params


def graphsage_regression_forward(x, edge_index, params):
    """Forward pass matching GraphSageRegression.forward (eval mode)."""
    N, Fin = x.shape
    Fout_final = params[-1][0].shape[1]
    Np = _padded_num_nodes(N)

    A, inv_deg = build_adjacency(edge_index, Np)

    # bf16 activations; feature dims padded to the 128-lane width (padded weight rows /
    # cols and bias entries are zero, so padded feature columns stay zero in every layer).
    h = _pad2d(x, Np, _round_up(Fin, LANE)).astype(jnp.bfloat16)

    n_layers = len(params)
    for li, (Wl, Wr, b) in enumerate(params):
        fin, fout = Wl.shape
        fin_p, fout_p = _round_up(fin, LANE), _round_up(fout, LANE)
        Wl_p = _pad2d(Wl, fin_p, fout_p).astype(jnp.bfloat16)
        Wr_p = _pad2d(Wr, fin_p, fout_p).astype(jnp.bfloat16)
        b_p = _pad2d(b, 1, fout_p).astype(jnp.float32)

        is_last = li == n_layers - 1

        # Y = h @ Wl (bf16), root = h @ Wr + b (f32), hoisted out of the k-loop.
        Y, root = sage_transform(h, Wl_p, Wr_p, b_p)

        # INVARIANT: padded node rows of `root` (and hence of h in later layers) carry the
        # bias / nonzero garbage, but padded *columns* of A are zero so they never reach
        # real rows; the final h[:N] slice discards them.
        h = sage_aggregate(
            A, Y, inv_deg, root,
            apply_relu=not is_last,
            out_dtype=jnp.float32 if is_last else jnp.bfloat16,
        )
        # Dropout (p=0.5) before the final conv is identity in eval mode.

    return h[:N, :Fout_final]


def reference_forward(x, edge_index, params):
    """Pure-JAX f32 reference with identical semantics (for correctness checking)."""
    N = x.shape[0]
    src, dst = edge_index[0], edge_index[1]
    counts = jnp.zeros((N, N), jnp.float32).at[dst, src].add(1.0)
    deg = counts.sum(axis=1, keepdims=True)
    inv = jnp.where(deg > 0, 1.0 / jnp.where(deg > 0, deg, 1.0), 0.0)
    h = x
    n_layers = len(params)
    for li, (Wl, Wr, b) in enumerate(params):
        agg = (counts @ h) * inv
        h = agg @ Wl + h @ Wr + b
        if li < n_layers - 1:
            h = jnp.maximum(h, 0.0)
    return h


if __name__ == "__main__":
    key = jax.random.PRNGKey(0)

    num_nodes = 16
    input_channels = 8
    hidden_channels = 32
    output_channels = 4
    num_edges = 40

    key, kx, ke_src, ke_dst, kp = jax.random.split(key, 5)
    x = jax.random.normal(kx, (num_nodes, input_channels), jnp.float32)
    src = jax.random.randint(ke_src, (num_edges,), 0, num_nodes)
    dst = jax.random.randint(ke_dst, (num_edges,), 0, num_nodes)
    edge_index = jnp.stack([src, dst], axis=0)  # [2, E], row 0 = src, row 1 = dst

    params = init_params(kp, input_channels, hidden_channels, output_channels,
                         num_layers=2)

    out = graphsage_regression_forward(x, edge_index, params)
    out = jax.block_until_ready(out)
    assert out.shape == (num_nodes, output_channels)
    assert bool(jnp.all(jnp.isfinite(out)))

    # Loose correctness check vs f32 reference (kernel uses bf16 activations/weights).
    ref = reference_forward(x, edge_index, params)
    max_err = float(jnp.max(jnp.abs(out - ref)))
    assert max_err < 0.15, f"max abs error vs reference: {max_err}"

    print("KERNEL_OK")
</pallas_src>

<mosaic_0001>
module attributes {stable_mosaic.version = 11 : i64} {
  func.func @_transform_kernel(%arg0: i32, %arg1: memref<128x128xbf16, #tpu.memory_space<vmem>>, %arg2: memref<128x128xbf16, #tpu.memory_space<vmem>>, %arg3: memref<128x128xbf16, #tpu.memory_space<vmem>>, %arg4: memref<1x128xf32, #tpu.memory_space<vmem>>, %arg5: memref<128x128xbf16, #tpu.memory_space<vmem>>, %arg6: memref<128x128xf32, #tpu.memory_space<vmem>>) attributes {dimension_semantics = [#tpu.dimension_semantics<parallel>], iteration_bounds = array<i64: 1>, scalar_prefetch = 0 : i64, scratch_operands = 0 : i64, tpu.core_type = #tpu.core_type<tc>, window_params = [{transform_indices = @transform_0, window_bounds = array<i64: 128, 128>}, {pipeline_mode = #tpu.pipeline_mode<synchronous>, transform_indices = @transform_1, window_bounds = array<i64: 128, 128>}, {pipeline_mode = #tpu.pipeline_mode<synchronous>, transform_indices = @transform_2, window_bounds = array<i64: 128, 128>}, {pipeline_mode = #tpu.pipeline_mode<synchronous>, transform_indices = @transform_3, window_bounds = array<i64: 1, 128>}, {transform_indices = @transform_4, window_bounds = array<i64: 128, 128>}, {transform_indices = @transform_5, window_bounds = array<i64: 128, 128>}]} {
    %c0 = arith.constant 0 : index
    %c0_0 = arith.constant 0 : index
    %0 = vector.load %arg1[%c0, %c0_0] : memref<128x128xbf16, #tpu.memory_space<vmem>>, vector<128x128xbf16>
    %c0_1 = arith.constant 0 : index
    %c0_2 = arith.constant 0 : index
    %1 = vector.load %arg2[%c0_1, %c0_2] : memref<128x128xbf16, #tpu.memory_space<vmem>>, vector<128x128xbf16>
    %cst = arith.constant dense<0.000000e+00> : vector<128x128xf32>
    %2 = tpu.matmul %0, %1, %cst {dimension_numbers = #tpu.dot_dimension_numbers<[1], [0], [0], [1], [0, 0, 1, 1], [], []>} : vector<128x128xbf16>, vector<128x128xbf16>, vector<128x128xf32> -> vector<128x128xf32>
    %3 = arith.truncf %2 : vector<128x128xf32> to vector<128x128xbf16>
    %c0_3 = arith.constant 0 : index
    %c0_4 = arith.constant 0 : index
    %4 = vector.load %arg5[%c0_3, %c0_4] : memref<128x128xbf16, #tpu.memory_space<vmem>>, vector<128x128xbf16>
    tpu.vector_store %arg5[%c0_3, %c0_4], %3 {strides = array<i32>} : memref<128x128xbf16, #tpu.memory_space<vmem>>, vector<128x128xbf16>,
    %c0_5 = arith.constant 0 : index
    %c0_6 = arith.constant 0 : index
    %5 = vector.load %arg3[%c0_5, %c0_6] : memref<128x128xbf16, #tpu.memory_space<vmem>>, vector<128x128xbf16>
    %cst_7 = arith.constant dense<0.000000e+00> : vector<128x128xf32>
    %6 = tpu.matmul %0, %5, %cst_7 {dimension_numbers = #tpu.dot_dimension_numbers<[1], [0], [0], [1], [0, 0, 1, 1], [], []>} : vector<128x128xbf16>, vector<128x128xbf16>, vector<128x128xf32> -> vector<128x128xf32>
    %c0_8 = arith.constant 0 : index
    %c0_9 = arith.constant 0 : index
    %7 = vector.load %arg4[%c0_8, %c0_9] : memref<1x128xf32, #tpu.memory_space<vmem>>, vector<1x128xf32>
    %8 = vector.broadcast %7 : vector<1x128xf32> to vector<128x128xf32>
    %9 = arith.addf %6, %8 : vector<128x128xf32>
    %c0_10 = arith.constant 0 : index
    %c0_11 = arith.constant 0 : index
    %10 = vector.load %arg6[%c0_10, %c0_11] : memref<128x128xf32, #tpu.memory_space<vmem>>, vector<128x128xf32>
    tpu.vector_store %arg6[%c0_10, %c0_11], %9 {strides = array<i32>} : memref<128x128xf32, #tpu.memory_space<vmem>>, vector<128x128xf32>,
    return
  }
  func.func @transform_0(%arg0: i32) -> (i32, i32) {
    %c0_i32 = arith.constant 0 : i32
    %c0_i32_0 = arith.constant 0 : i32
    return %arg0, %c0_i32 : i32, i32
  }
  func.func @transform_1(%arg0: i32) -> (i32, i32) {
    %c0_i32 = arith.constant 0 : i32
    %c0_i32_0 = arith.constant 0 : i32
    %c0_i32_1 = arith.constant 0 : i32
    return %c0_i32, %c0_i32_0 : i32, i32
  }
  func.func @transform_2(%arg0: i32) -> (i32, i32) {
    %c0_i32 = arith.constant 0 : i32
    %c0_i32_0 = arith.constant 0 : i32
    %c0_i32_1 = arith.constant 0 : i32
    return %c0_i32, %c0_i32_0 : i32, i32
  }
  func.func @transform_3(%arg0: i32) -> (i32, i32) {
    %c0_i32 = arith.constant 0 : i32
    %c0_i32_0 = arith.constant 0 : i32
    %c0_i32_1 = arith.constant 0 : i32
    return %c0_i32, %c0_i32_0 : i32, i32
  }
  func.func @transform_4(%arg0: i32) -> (i32, i32) {
    %c0_i32 = arith.constant 0 : i32
    %c0_i32_0 = arith.constant 0 : i32
    return %arg0, %c0_i32 : i32, i32
  }
  func.func @transform_5(%arg0: i32) -> (i32, i32) {
    %c0_i32 = arith.constant 0 : i32
    %c0_i32_0 = arith.constant 0 : i32
    return %arg0, %c0_i32 : i32, i32
  }
}

</mosaic_0001>

<bundles_post_ra>
// kernel: tpu_custom_call.1
= control target key start
LH: loop header
LB: loop body
LE: loop exit
PB: predicated region body
PF: predicated region fallthrough
CT: control target
= control target key end

     0   :  { %11 = vsyncpa [#allocation3], 0  ;;  %s856_s0 = inlined_call_operand.hbm [shape: bf16[128,128], index: 0, kind: input, shape index: {}]   ;;  %s857_s1 = inlined_call_operand.hbm [shape: bf16[128,128], index: 1, kind: input, shape index: {}]   ;;  %s858_s2 = inlined_call_operand.hbm [shape: bf16[128,128], index: 2, kind: input, shape index: {}]   ;;  %s859_s3 = inlined_call_operand.vmem [shape: f32[1,128], index: 3, kind: input, shape index: {}]   ;;  %s860_s4 = inlined_call_operand.hbm [shape: bf16[128,128], index: 4, kind: output, shape index: {0}]   ;;  %s861_s5 = inlined_call_operand.hbm [shape: f32[128,128], index: 5, kind: output, shape index: {1}]  }
   0x1   :  { %12 = vsyncpa [#allocation6], 0 }
   0x2   :  { %13 = vsyncpa [#allocation4], 0 }
   0x3   :  { %14 = vsyncpa [#allocation10], 0  ;;  %s32_s20 = sshll.u32 %s857_s1, 4  ;;  %s769_s21 = smov [#allocation5]   ;;  %s33_s20 = int_to_ptr.hbm [resolvable:$true] %s32_s20 }
   0x4   :  { %s34_s22 = sshll.u32 %s769_s21, 4  ;;  %s19_s25 = sshll.u32 %s856_s0, 4  ;;  %s35_s22 = int_to_ptr.vmem [resolvable:$true] %s34_s22  ;;  %s20_s25 = int_to_ptr.hbm [resolvable:$true] %s19_s25 }
   0x5   :  { %s770_s26 = smov 64   ;;  %s771_s27 = smov 4  }
   0x6   :  { %40 = dma.hbm_to_vmem [thread:$0]  %s33_s20, 1024, %s35_s22, [#allocation6], %s770_s26, %s770_s26, %s771_s27  }
   0x7   :  { %s772_s28 = smov [#allocation2]   ;;  %s45_s1 = sshll.u32 %s858_s2, 4  ;;  %s46_s1 = int_to_ptr.hbm [resolvable:$true] %s45_s1 }
   0x8   :  { %s21_s29 = sshll.u32 %s772_s28, 4  ;;  %s773_s0 = smov [#allocation7]   ;;  %s22_s29 = int_to_ptr.vmem [resolvable:$true] %s21_s29 }
   0x9   :  { %27 = dma.hbm_to_vmem [thread:$0]  %s20_s25, 1024, %s22_s29, [#allocation3], %s770_s26, %s770_s26, %s771_s27  }
   0xa   :  { %s47_s7 = sshll.u32 %s773_s0, 4  ;;  %s48_s7 = int_to_ptr.vmem [resolvable:$true] %s47_s7 }
   0xb   :  { %53 = dma.hbm_to_vmem [thread:$0]  %s46_s1, 1024, %s48_s7, [#allocation6], %s770_s26, %s770_s26, %s771_s27  }
   0xc   :  { %761 = dma.done.wait [#allocation3], 1024  }
   0xd   :  { %762 = vsyncadd [#allocation3], 4294966272 }
   0xe   :  { %763 = dma.done.wait [#allocation6], 2048  }
   0xf   :  { %764 = vsyncadd [#allocation6], 4294965248  ;;  %v559_v0 = vld [vmem:[#allocation5 + $0x38] sm:$0xff]  ;;  %v558_v2 = vld [vmem:[#allocation5 + $0x30] sm:$0xff]  ;;  %s416_s12 = sshll.u32 %s860_s4, 4  ;;  %s775_s13 = smov [#allocation9]   ;;  %s417_s12 = int_to_ptr.hbm [resolvable:$true] %s416_s12 }
  0x10   :  { %v567_v1 = vld [vmem:[#allocation7 + $0x38] sm:$0xff]  ;;  %196 = vmatpush.bf16.msra.mxu0 %v559_v0  ;;  %615 = vmatpush.bf16.msra.mxu2 %v559_v0  ;;  %v566_v3 = vld [vmem:[#allocation7 + $0x30] sm:$0xff]  ;;  %v557_v4 = vld [vmem:[#allocation5 + $0x28] sm:$0xff]  ;;  %s427_s14 = sshll.u32 %s775_s13, 4  ;;  %s429_s17 = sshll.u32 %s861_s5, 4  ;;  %s428_s14 = int_to_ptr.vmem [resolvable:$true] %s427_s14  ;;  %s430_s17 = int_to_ptr.hbm [resolvable:$true] %s429_s17 }
  0x11   :  { %345 = vmatpush.bf16.msra.mxu1 %v567_v1  ;;  %623 = vmatpush.bf16.msra.mxu3 %v567_v1  ;;  %v565_v5 = vld [vmem:[#allocation7 + $0x28] sm:$0xff]  ;;  %v556_v6 = vld [vmem:[#allocation5 + $0x20] sm:$0xff]  ;;  %v555_v8 = vld [vmem:[#allocation5 + $0x18] sm:$0xff]  ;;  %s776_s4 = smov 128   ;;  %s777_s18 = smov 8  }
  0x12   :  { %v564_v7 = vld [vmem:[#allocation7 + $0x20] sm:$0xff]  ;;  %v563_v9 = vld [vmem:[#allocation7 + $0x18] sm:$0xff]  ;;  %v554_v10 = vld [vmem:[#allocation5 + $0x10] sm:$0xff] }
  0x13   :  { %v562_v11 = vld [vmem:[#allocation7 + $0x10] sm:$0xff]  ;;  %v553_v12 = vld [vmem:[#allocation5 + $0x8] sm:$0xff]  ;;  %v552_v14 = vld [vmem:[#allocation5] sm:$0xff] }
  0x14   :  { %197 = vmatpush.bf16.msra.mxu0 %v558_v2  ;;  %616 = vmatpush.bf16.msra.mxu2 %v558_v2  ;;  %v561_v13 = vld [vmem:[#allocation7 + $0x8] sm:$0xff]  ;;  %v560_v15 = vld [vmem:[#allocation7] sm:$0xff]  ;;  %v546_v20 = vld [vmem:[#allocation2 + $0x10] sm:$0xff] }
  0x15   :  { %346 = vmatpush.bf16.msra.mxu1 %v566_v3  ;;  %624 = vmatpush.bf16.msra.mxu3 %v566_v3  ;;  %v544_v16 = vld [vmem:[#allocation2] sm:$0xff]  ;;  %v545_v18 = vld [vmem:[#allocation2 + $0x8] sm:$0xff]  ;;  %v550_v21 = vld [vmem:[#allocation2 + $0x30] sm:$0xff] }
  0x16   :  { %v548_v17 = vld [vmem:[#allocation2 + $0x20] sm:$0xff]  ;;  %v549_v19 = vld [vmem:[#allocation2 + $0x28] sm:$0xff]  ;;  %v547_v22 = vld [vmem:[#allocation2 + $0x18] sm:$0xff] }
  0x17   :  { %v551_v23 = vld [vmem:[#allocation2 + $0x38] sm:$0xff]  ;;  %v829_v24 = vld [vmem:[%s859_s3] ss:$0 sm:$0xff]  ;;  %s774_s3 = smov [#allocation8]  }
  0x18   :  { %198 = vmatpush.bf16.msra.mxu0 %v557_v4  ;;  %617 = vmatpush.bf16.msra.mxu2 %v557_v4  ;;  %s414_s9 = sshll.u32 %s774_s3, 4  ;;  %s415_s9 = int_to_ptr.vmem [resolvable:$true] %s414_s9 }
  0x19   :  { %347 = vmatpush.bf16.msra.mxu1 %v565_v5  ;;  %625 = vmatpush.bf16.msra.mxu3 %v565_v5 }
  0x1c   :  { %199 = vmatpush.bf16.msra.mxu0 %v556_v6  ;;  %618 = vmatpush.bf16.msra.mxu2 %v556_v6 }
  0x1d   :  { %348 = vmatpush.bf16.msra.mxu1 %v564_v7  ;;  %626 = vmatpush.bf16.msra.mxu3 %v564_v7 }
  0x20   :  { %200 = vmatpush.bf16.msra.mxu0 %v555_v8  ;;  %619 = vmatpush.bf16.msra.mxu2 %v555_v8 }
  0x21   :  { %349 = vmatpush.bf16.msra.mxu1 %v563_v9  ;;  %627 = vmatpush.bf16.msra.mxu3 %v563_v9 }
  0x24   :  { %201 = vmatpush.bf16.msra.mxu0 %v554_v10  ;;  %620 = vmatpush.bf16.msra.mxu2 %v554_v10 }
  0x25   :  { %350 = vmatpush.bf16.msra.mxu1 %v562_v11  ;;  %628 = vmatpush.bf16.msra.mxu3 %v562_v11 }
  0x28   :  { %202 = vmatpush.bf16.msra.mxu0 %v553_v12  ;;  %621 = vmatpush.bf16.msra.mxu2 %v553_v12 }
  0x29   :  { %351 = vmatpush.bf16.msra.mxu1 %v561_v13  ;;  %629 = vmatpush.bf16.msra.mxu3 %v561_v13 }
  0x2c   :  { %203 = vmatpush.bf16.msra.mxu0 %v552_v14  ;;  %622 = vmatpush.bf16.msra.mxu2 %v552_v14 }
  0x2d   :  { %352 = vmatpush.bf16.msra.mxu1 %v560_v15  ;;  %630 = vmatpush.bf16.msra.mxu3 %v560_v15 }
  0x2f   :  { %204 = vmatmul.bf16.vlgmr.msra.gmra.mxu0 %v544_v16  ;;  %224 = vmatmul.bf16.vlgmr.msra.gmra.mxu2 %v548_v17 }
  0x30   :  { %353 = vmatmul.bf16.vlgmr.msra.gmra.mxu1 %v544_v16  ;;  %373 = vmatmul.bf16.vlgmr.msra.gmra.mxu3 %v548_v17 }
  0x3f   :  { %209 = vmatmul.bf16.gmra.mxu0 %v545_v18  ;;  %229 = vmatmul.bf16.gmra.mxu2 %v549_v19 }
  0x40   :  { %358 = vmatmul.bf16.gmra.mxu1 %v545_v18  ;;  %378 = vmatmul.bf16.gmra.mxu3 %v549_v19 }
  0x4f   :  { %214 = vmatmul.bf16.gmra.mxu0 %v546_v20  ;;  %234 = vmatmul.bf16.gmra.mxu2 %v550_v21 }
  0x50   :  { %363 = vmatmul.bf16.gmra.mxu1 %v546_v20  ;;  %383 = vmatmul.bf16.gmra.mxu3 %v550_v21 }
  0x5f   :  { %219 = vmatmul.bf16.gmra.mxu0 %v547_v22  ;;  %239 = vmatmul.bf16.gmra.mxu2 %v551_v23 }
  0x60   :  { %368 = vmatmul.bf16.gmra.mxu1 %v547_v22  ;;  %388 = vmatmul.bf16.gmra.mxu3 %v551_v23 }
  0xac   :  { %v205_v25 = vpop.f32.mrf.mxu0 }
  0xad   :  { %v354_v26 = vpop.f32.mrf.mxu1 }
  0xae   :  { %v355_v27 = vadd.f32 %v829_v24, %v354_v26 }
  0xb0   :  { %394 = vst [vmem:[#allocation9] sm:$0xff] %v355_v27 }
  0xb2   :  { %v225_v28 = vpop.f32.mrf.mxu2 }
  0xb3   :  { %v374_v29 = vpop.f32.mrf.mxu3 }
  0xb4   :  { %v375_v30 = vadd.f32 %v829_v24, %v374_v29  ;;  %v207_v31 = vpop.f32.mrf.mxu0 }
  0xb5   :  { %v571_v32 = vpack.c.bf16 %v207_v31, %v205_v25  ;;  %v356_v33 = vpop.f32.mrf.mxu1 }
  0xb6   :  { %402 = vst [vmem:[#allocation9 + $0x40] sm:$0xff] %v375_v30  ;;  %v357_v34 = vadd.f32 %v829_v24, %v356_v33 }
  0xb7   :  { %572 = vst [vmem:[#allocation8] sm:$0xff] %v571_v32  }
  0xb8   :  { %395 = vst [vmem:[#allocation9 + $0x8] sm:$0xff] %v357_v34 }
  0xba   :  { %v227_v35 = vpop.f32.mrf.mxu2 }
  0xbb   :  { %v591_v36 = vpack.c.bf16 %v227_v35, %v225_v28  ;;  %v376_v37 = vpop.f32.mrf.mxu3 }
  0xbc   :  { %v377_v38 = vadd.f32 %v829_v24, %v376_v37  ;;  %v210_v39 = vpop.f32.mrf.mxu0 }
  0xbd   :  { %611 = vst [vmem:[#allocation8 + $0x20] sm:$0xff] %v591_v36   ;;  %v359_v40 = vpop.f32.mrf.mxu1 }
  0xbe   :  { %403 = vst [vmem:[#allocation9 + $0x48] sm:$0xff] %v377_v38  ;;  %v360_v41 = vadd.f32 %v829_v24, %v359_v40 }
  0xc0   :  { %396 = vst [vmem:[#allocation9 + $0x10] sm:$0xff] %v360_v41 }
  0xc2   :  { %v230_v42 = vpop.f32.mrf.mxu2 }
  0xc3   :  { %v379_v43 = vpop.f32.mrf.mxu3 }
  0xc4   :  { %v380_v44 = vadd.f32 %v829_v24, %v379_v43  ;;  %v212_v45 = vpop.f32.mrf.mxu0 }
  0xc5   :  { %v576_v46 = vpack.c.bf16 %v212_v45, %v210_v39  ;;  %v361_v47 = vpop.f32.mrf.mxu1 }
  0xc6   :  { %404 = vst [vmem:[#allocation9 + $0x50] sm:$0xff] %v380_v44  ;;  %v362_v48 = vadd.f32 %v829_v24, %v361_v47 }
  0xc7   :  { %608 = vst [vmem:[#allocation8 + $0x8] sm:$0xff] %v576_v46  }
  0xc8   :  { %397 = vst [vmem:[#allocation9 + $0x18] sm:$0xff] %v362_v48 }
  0xca   :  { %v232_v49 = vpop.f32.mrf.mxu2 }
  0xcb   :  { %v596_v50 = vpack.c.bf16 %v232_v49, %v230_v42  ;;  %v381_v51 = vpop.f32.mrf.mxu3 }
  0xcc   :  { %v382_v52 = vadd.f32 %v829_v24, %v381_v51  ;;  %v215_v53 = vpop.f32.mrf.mxu0 }
  0xcd   :  { %612 = vst [vmem:[#allocation8 + $0x28] sm:$0xff] %v596_v50   ;;  %v364_v54 = vpop.f32.mrf.mxu1 }
  0xce   :  { %405 = vst [vmem:[#allocation9 + $0x58] sm:$0xff] %v382_v52  ;;  %v365_v55 = vadd.f32 %v829_v24, %v364_v54 }
  0xd0   :  { %398 = vst [vmem:[#allocation9 + $0x20] sm:$0xff] %v365_v55 }
  0xd2   :  { %v235_v56 = vpop.f32.mrf.mxu2 }
  0xd3   :  { %v384_v57 = vpop.f32.mrf.mxu3 }
  0xd4   :  { %v385_v58 = vadd.f32 %v829_v24, %v384_v57  ;;  %v217_v59 = vpop.f32.mrf.mxu0 }
  0xd5   :  { %v581_v60 = vpack.c.bf16 %v217_v59, %v215_v53  ;;  %v366_v61 = vpop.f32.mrf.mxu1 }
  0xd6   :  { %406 = vst [vmem:[#allocation9 + $0x60] sm:$0xff] %v385_v58  ;;  %v367_v62 = vadd.f32 %v829_v24, %v366_v61 }
  0xd7   :  { %609 = vst [vmem:[#allocation8 + $0x10] sm:$0xff] %v581_v60  }
  0xd8   :  { %399 = vst [vmem:[#allocation9 + $0x28] sm:$0xff] %v367_v62 }
  0xda   :  { %v237_v63 = vpop.f32.mrf.mxu2 }
  0xdb   :  { %v601_v0 = vpack.c.bf16 %v237_v63, %v235_v56  ;;  %v386_v1 = vpop.f32.mrf.mxu3 }
  0xdc   :  { %v387_v2 = vadd.f32 %v829_v24, %v386_v1  ;;  %v220_v3 = vpop.f32.mrf.mxu0 }
  0xdd   :  { %613 = vst [vmem:[#allocation8 + $0x30] sm:$0xff] %v601_v0   ;;  %v369_v4 = vpop.f32.mrf.mxu1 }
  0xde   :  { %407 = vst [vmem:[#allocation9 + $0x68] sm:$0xff] %v387_v2  ;;  %v370_v5 = vadd.f32 %v829_v24, %v369_v4 }
  0xe0   :  { %400 = vst [vmem:[#allocation9 + $0x30] sm:$0xff] %v370_v5 }
  0xe2   :  { %v240_v6 = vpop.f32.mrf.mxu2 }
  0xe3   :  { %v389_v7 = vpop.f32.mrf.mxu3 }
  0xe4   :  { %v390_v8 = vadd.f32 %v829_v24, %v389_v7  ;;  %v222_v9 = vpop.f32.mrf.mxu0 }
  0xe5   :  { %v586_v10 = vpack.c.bf16 %v222_v9, %v220_v3  ;;  %v371_v11 = vpop.f32.mrf.mxu1 }
  0xe6   :  { %408 = vst [vmem:[#allocation9 + $0x70] sm:$0xff] %v390_v8  ;;  %v372_v12 = vadd.f32 %v829_v24, %v371_v11 }
  0xe7   :  { %610 = vst [vmem:[#allocation8 + $0x18] sm:$0xff] %v586_v10  }
  0xe8   :  { %401 = vst [vmem:[#allocation9 + $0x38] sm:$0xff] %v372_v12 }
  0xea   :  { %v242_v13 = vpop.f32.mrf.mxu2 }
  0xeb   :  { %v606_v14 = vpack.c.bf16 %v242_v13, %v240_v6  ;;  %v391_v15 = vpop.f32.mrf.mxu3 }
  0xec   :  { %v392_v16 = vadd.f32 %v829_v24, %v391_v15 }
  0xed   :  { %614 = vst [vmem:[#allocation8 + $0x38] sm:$0xff] %v606_v14  }
  0xee   :  { %409 = vst [vmem:[#allocation9 + $0x78] sm:$0xff] %v392_v16  ;;  %422 = dma.vmem_to_hbm [thread:$0]  %s415_s9, 1024, %s417_s12, [#allocation4], %s770_s26, %s770_s26, %s771_s27  }
  0xef   :  { %435 = dma.vmem_to_hbm [thread:$0]  %s428_s14, 2048, %s430_s17, [#allocation10], %s776_s4, %s776_s4, %s777_s18  }
  0xf0   :  { %765 = dma.done.wait [#allocation4], 1024  }
  0xf1   :  { %766 = vsyncadd [#allocation4], 4294966272 }
  0xf2   :  { %767 = dma.done.wait [#allocation10], 2048  }
  0xf3   :  { %768 = vsyncadd [#allocation10], 4294965248 }
  0xf4   :  { %444 = vsyncpa [#allocation3], 1 }
  0xf5   :  { %445 = vsyncpa [#allocation6], 1 }
  0xf6   :  { %446 = vsyncpa [#allocation4], 1 }
  0xf7   :  { %447 = vsyncpa [#allocation10], 1 }

</bundles_post_ra>
